<compile_context>
chip_gen: v5e
topology: v5e:2x2
jax: 0.10.0
libtpu: 0.0.40
codegen_flags: <defaults>
</compile_context>

<pallas_src>
import jax
import jax.numpy as jnp
from jax.experimental import pallas as pl
from jax.experimental.pallas import tpu as pltpu

HIDDEN1 = 400
HIDDEN2 = 300


def _round_up(n, m):
    return ((n + m - 1) // m) * m


def _actor_kernel(x_ref, w1_ref, b1_ref, w2_ref, b2_ref, w3_ref, b3_ref, o_ref):
    # Layer 1: Linear(obs, 400) + ReLU.  bf16 operands, f32 accumulation.
    h1 = jnp.dot(x_ref[...], w1_ref[...], preferred_element_type=jnp.float32)
    h1 = jnp.maximum(h1 + b1_ref[...], 0.0)
    # Layer 2: Linear(400, 300) + ReLU.
    h2 = jnp.dot(h1.astype(jnp.bfloat16), w2_ref[...],
                 preferred_element_type=jnp.float32)
    h2 = jnp.maximum(h2 + b2_ref[...], 0.0)
    # Layer 3: Linear(300, act) + Tanh (elementwise math stays f32).
    h3 = jnp.dot(h2.astype(jnp.bfloat16), w3_ref[...],
                 preferred_element_type=jnp.float32)
    o_ref[...] = jnp.tanh(h3 + b3_ref[...])


def init_params(key, obs_size, act_size):
    """f32 params mimicking PyTorch nn.Linear default init (U(-1/sqrt(fan_in), +)).

    Weights are stored [in_features, out_features] (transpose of torch layout),
    biases [1, out_features].
    """
    def linear_init(k, fan_in, fan_out):
        kw, kb = jax.random.split(k)
        bound = 1.0 / jnp.sqrt(jnp.float32(fan_in))
        w = jax.random.uniform(kw, (fan_in, fan_out), jnp.float32, -bound, bound)
        b = jax.random.uniform(kb, (1, fan_out), jnp.float32, -bound, bound)
        return w, b

    k1, k2, k3 = jax.random.split(key, 3)
    w1, b1 = linear_init(k1, obs_size, HIDDEN1)
    w2, b2 = linear_init(k2, HIDDEN1, HIDDEN2)
    w3, b3 = linear_init(k3, HIDDEN2, act_size)
    return {"w1": w1, "b1": b1, "w2": w2, "b2": b2, "w3": w3, "b3": b3}


def prepare_kernel_params(params):
    """Zero-pad feature dims to TPU-friendly sizes, cast weights to bf16."""
    w1, w2, w3 = params["w1"], params["w2"], params["w3"]
    b1, b2, b3 = params["b1"], params["b2"], params["b3"]
    obs, h1 = w1.shape
    h2 = w2.shape[1]
    act = w3.shape[1]

    obs_p = _round_up(obs, 8)     # sublane-friendly K for layer 1
    h1_p = _round_up(h1, 256)     # clean 256-wide MXU contraction on v6e/v7x
    h2_p = _round_up(h2, 256)
    act_p = _round_up(act, 128)   # lane-dense output store

    def pad_w(w, r, c):
        out = jnp.zeros((r, c), jnp.float32).at[: w.shape[0], : w.shape[1]].set(w)
        return out.astype(jnp.bfloat16)

    def pad_b(b, c):
        return jnp.zeros((1, c), jnp.float32).at[:, : b.shape[1]].set(b)

    return {
        "w1": pad_w(w1, obs_p, h1_p), "b1": pad_b(b1, h1_p),
        "w2": pad_w(w2, h1_p, h2_p),  "b2": pad_b(b2, h2_p),
        "w3": pad_w(w3, h2_p, act_p), "b3": pad_b(b3, act_p),
        "obs": obs, "act": act,
    }


def ddpg_actor_forward(x, kparams, *, block_b=256):
    """x: [B, obs_size] f32; kparams: output of prepare_kernel_params."""
    B, obs = x.shape
    assert obs == kparams["obs"]
    obs_p, h1_p = kparams["w1"].shape
    h2_p = kparams["w2"].shape[1]
    act_p = kparams["w3"].shape[1]
    act = kparams["act"]

    # Batch tile: multiple of 8 sublanes; pad ragged last tile with zero rows.
    tb = min(block_b, _round_up(B, 8))
    b_pad = _round_up(B, tb)

    # Pad batch/obs and cast activations to bf16 (MXU-native operand dtype).
    x_p = (jnp.zeros((b_pad, obs_p), jnp.float32)
           .at[:B, :obs].set(x)
           .astype(jnp.bfloat16))

    const = lambda i: (0, 0)  # weights/biases resident across batch tiles

    flops = 2 * b_pad * (obs_p * h1_p + h1_p * h2_p + h2_p * act_p)
    bytes_accessed = (
        x_p.size * 2
        + sum(kparams[k].size * 2 for k in ("w1", "w2", "w3"))
        + sum(kparams[k].size * 4 for k in ("b1", "b2", "b3"))
        + b_pad * act_p * 4
    )

    out = pl.pallas_call(
        _actor_kernel,
        out_shape=jax.ShapeDtypeStruct((b_pad, act_p), jnp.float32),
        grid=(b_pad // tb,),
        in_specs=[
            pl.BlockSpec((tb, obs_p), lambda i: (i, 0)),   # x: batch-tiled
            pl.BlockSpec((obs_p, h1_p), const),
            pl.BlockSpec((1, h1_p), const),
            pl.BlockSpec((h1_p, h2_p), const),
            pl.BlockSpec((1, h2_p), const),
            pl.BlockSpec((h2_p, act_p), const),
            pl.BlockSpec((1, act_p), const),
        ],
        out_specs=pl.BlockSpec((tb, act_p), lambda i: (i, 0)),
        compiler_params=pltpu.CompilerParams(
            dimension_semantics=("parallel",),
        ),
        cost_estimate=pl.CostEstimate(
            flops=flops,
            transcendentals=b_pad * act_p,
            bytes_accessed=bytes_accessed,
        ),
    )(x_p, kparams["w1"], kparams["b1"], kparams["w2"], kparams["b2"],
      kparams["w3"], kparams["b3"])

    return out[:B, :act]


def _reference_forward_f32(x, p):
    h1 = jnp.maximum(x @ p["w1"] + p["b1"], 0.0)
    h2 = jnp.maximum(h1 @ p["w2"] + p["b2"], 0.0)
    return jnp.tanh(h2 @ p["w3"] + p["b3"])


def _reference_forward_bf16(x, p):
    def dot_bf16(a, w):
        return jnp.dot(a.astype(jnp.bfloat16), w.astype(jnp.bfloat16),
                       preferred_element_type=jnp.float32)
    h1 = jnp.maximum(dot_bf16(x, p["w1"]) + p["b1"], 0.0)
    h2 = jnp.maximum(dot_bf16(h1, p["w2"]) + p["b2"], 0.0)
    return jnp.tanh(dot_bf16(h2, p["w3"]) + p["b3"])


if __name__ == "__main__":
    # Ant PyBullet: obs_size=28, act_size=8; small batch for the demo.
    batch, obs_size, act_size = 2, 28, 8

    key = jax.random.PRNGKey(0)
    k_params, k_x = jax.random.split(key)
    params = init_params(k_params, obs_size, act_size)
    kparams = prepare_kernel_params(params)
    x = jax.random.normal(k_x, (batch, obs_size), jnp.float32)

    out = ddpg_actor_forward(x, kparams)
    out = jax.block_until_ready(out)

    ref_bf16 = _reference_forward_bf16(x, params)  # same bf16-operand math
    ref_f32 = _reference_forward_f32(x, params)    # pure f32 reference

    assert out.shape == (batch, act_size)
    assert jnp.allclose(out, ref_bf16, atol=1e-2, rtol=1e-2), "mismatch vs bf16 reference"
    assert jnp.allclose(out, ref_f32, atol=5e-2, rtol=5e-2), "mismatch vs f32 reference"

    print("KERNEL_OK")
</pallas_src>

<mosaic_0001>
module attributes {stable_mosaic.version = 11 : i64} {
  func.func @_actor_kernel(%arg0: i32, %arg1: memref<8x32xbf16, #tpu.memory_space<vmem>>, %arg2: memref<32x512xbf16, #tpu.memory_space<vmem>>, %arg3: memref<1x512xf32, #tpu.memory_space<vmem>>, %arg4: memref<512x512xbf16, #tpu.memory_space<vmem>>, %arg5: memref<1x512xf32, #tpu.memory_space<vmem>>, %arg6: memref<512x128xbf16, #tpu.memory_space<vmem>>, %arg7: memref<1x128xf32, #tpu.memory_space<vmem>>, %arg8: memref<8x128xf32, #tpu.memory_space<vmem>>) attributes {dimension_semantics = [#tpu.dimension_semantics<parallel>], iteration_bounds = array<i64: 1>, scalar_prefetch = 0 : i64, scratch_operands = 0 : i64, tpu.core_type = #tpu.core_type<tc>, window_params = [{transform_indices = @transform_0, window_bounds = array<i64: 8, 32>}, {pipeline_mode = #tpu.pipeline_mode<synchronous>, transform_indices = @transform_1, window_bounds = array<i64: 32, 512>}, {pipeline_mode = #tpu.pipeline_mode<synchronous>, transform_indices = @transform_2, window_bounds = array<i64: 1, 512>}, {pipeline_mode = #tpu.pipeline_mode<synchronous>, transform_indices = @transform_3, window_bounds = array<i64: 512, 512>}, {pipeline_mode = #tpu.pipeline_mode<synchronous>, transform_indices = @transform_4, window_bounds = array<i64: 1, 512>}, {pipeline_mode = #tpu.pipeline_mode<synchronous>, transform_indices = @transform_5, window_bounds = array<i64: 512, 128>}, {pipeline_mode = #tpu.pipeline_mode<synchronous>, transform_indices = @transform_6, window_bounds = array<i64: 1, 128>}, {transform_indices = @transform_7, window_bounds = array<i64: 8, 128>}]} {
    %c0 = arith.constant 0 : index
    %c0_0 = arith.constant 0 : index
    %0 = vector.load %arg1[%c0, %c0_0] : memref<8x32xbf16, #tpu.memory_space<vmem>>, vector<8x32xbf16>
    %c0_1 = arith.constant 0 : index
    %c0_2 = arith.constant 0 : index
    %1 = vector.load %arg2[%c0_1, %c0_2] : memref<32x512xbf16, #tpu.memory_space<vmem>>, vector<32x512xbf16>
    %cst = arith.constant dense<0.000000e+00> : vector<8x512xf32>
    %2 = tpu.matmul %0, %1, %cst {dimension_numbers = #tpu.dot_dimension_numbers<[1], [0], [0], [1], [0, 0, 1, 1], [], []>} : vector<8x32xbf16>, vector<32x512xbf16>, vector<8x512xf32> -> vector<8x512xf32>
    %c0_3 = arith.constant 0 : index
    %c0_4 = arith.constant 0 : index
    %3 = vector.load %arg3[%c0_3, %c0_4] : memref<1x512xf32, #tpu.memory_space<vmem>>, vector<1x512xf32>
    %4 = vector.broadcast %3 : vector<1x512xf32> to vector<8x512xf32>
    %5 = arith.addf %2, %4 : vector<8x512xf32>
    %cst_5 = arith.constant 0.000000e+00 : f32
    %6 = vector.broadcast %cst_5 : f32 to vector<8x512xf32>
    %7 = arith.maximumf %5, %6 : vector<8x512xf32>
    %8 = arith.truncf %7 : vector<8x512xf32> to vector<8x512xbf16>
    %c0_6 = arith.constant 0 : index
    %c0_7 = arith.constant 0 : index
    %9 = vector.load %arg4[%c0_6, %c0_7] : memref<512x512xbf16, #tpu.memory_space<vmem>>, vector<512x512xbf16>
    %cst_8 = arith.constant dense<0.000000e+00> : vector<8x512xf32>
    %10 = tpu.matmul %8, %9, %cst_8 {dimension_numbers = #tpu.dot_dimension_numbers<[1], [0], [0], [1], [0, 0, 1, 1], [], []>} : vector<8x512xbf16>, vector<512x512xbf16>, vector<8x512xf32> -> vector<8x512xf32>
    %c0_9 = arith.constant 0 : index
    %c0_10 = arith.constant 0 : index
    %11 = vector.load %arg5[%c0_9, %c0_10] : memref<1x512xf32, #tpu.memory_space<vmem>>, vector<1x512xf32>
    %12 = vector.broadcast %11 : vector<1x512xf32> to vector<8x512xf32>
    %13 = arith.addf %10, %12 : vector<8x512xf32>
    %cst_11 = arith.constant 0.000000e+00 : f32
    %14 = vector.broadcast %cst_11 : f32 to vector<8x512xf32>
    %15 = arith.maximumf %13, %14 : vector<8x512xf32>
    %16 = arith.truncf %15 : vector<8x512xf32> to vector<8x512xbf16>
    %c0_12 = arith.constant 0 : index
    %c0_13 = arith.constant 0 : index
    %17 = vector.load %arg6[%c0_12, %c0_13] : memref<512x128xbf16, #tpu.memory_space<vmem>>, vector<512x128xbf16>
    %cst_14 = arith.constant dense<0.000000e+00> : vector<8x128xf32>
    %18 = tpu.matmul %16, %17, %cst_14 {dimension_numbers = #tpu.dot_dimension_numbers<[1], [0], [0], [1], [0, 0, 1, 1], [], []>} : vector<8x512xbf16>, vector<512x128xbf16>, vector<8x128xf32> -> vector<8x128xf32>
    %c0_15 = arith.constant 0 : index
    %c0_16 = arith.constant 0 : index
    %19 = vector.load %arg7[%c0_15, %c0_16] : memref<1x128xf32, #tpu.memory_space<vmem>>, vector<1x128xf32>
    %20 = vector.broadcast %19 : vector<1x128xf32> to vector<8x128xf32>
    %21 = arith.addf %18, %20 : vector<8x128xf32>
    %22 = math.tanh %21 : vector<8x128xf32>
    %c0_17 = arith.constant 0 : index
    %c0_18 = arith.constant 0 : index
    %23 = vector.load %arg8[%c0_17, %c0_18] : memref<8x128xf32, #tpu.memory_space<vmem>>, vector<8x128xf32>
    tpu.vector_store %arg8[%c0_17, %c0_18], %22 {strides = array<i32>} : memref<8x128xf32, #tpu.memory_space<vmem>>, vector<8x128xf32>,
    return
  }
  func.func @transform_0(%arg0: i32) -> (i32, i32) {
    %c0_i32 = arith.constant 0 : i32
    %c0_i32_0 = arith.constant 0 : i32
    return %arg0, %c0_i32 : i32, i32
  }
  func.func @transform_1(%arg0: i32) -> (i32, i32) {
    %c0_i32 = arith.constant 0 : i32
    %c0_i32_0 = arith.constant 0 : i32
    %c0_i32_1 = arith.constant 0 : i32
    return %c0_i32, %c0_i32_0 : i32, i32
  }
  func.func @transform_2(%arg0: i32) -> (i32, i32) {
    %c0_i32 = arith.constant 0 : i32
    %c0_i32_0 = arith.constant 0 : i32
    %c0_i32_1 = arith.constant 0 : i32
    return %c0_i32, %c0_i32_0 : i32, i32
  }
  func.func @transform_3(%arg0: i32) -> (i32, i32) {
    %c0_i32 = arith.constant 0 : i32
    %c0_i32_0 = arith.constant 0 : i32
    %c0_i32_1 = arith.constant 0 : i32
    return %c0_i32, %c0_i32_0 : i32, i32
  }
  func.func @transform_4(%arg0: i32) -> (i32, i32) {
    %c0_i32 = arith.constant 0 : i32
    %c0_i32_0 = arith.constant 0 : i32
    %c0_i32_1 = arith.constant 0 : i32
    return %c0_i32, %c0_i32_0 : i32, i32
  }
  func.func @transform_5(%arg0: i32) -> (i32, i32) {
    %c0_i32 = arith.constant 0 : i32
    %c0_i32_0 = arith.constant 0 : i32
    %c0_i32_1 = arith.constant 0 : i32
    return %c0_i32, %c0_i32_0 : i32, i32
  }
  func.func @transform_6(%arg0: i32) -> (i32, i32) {
    %c0_i32 = arith.constant 0 : i32
    %c0_i32_0 = arith.constant 0 : i32
    %c0_i32_1 = arith.constant 0 : i32
    return %c0_i32, %c0_i32_0 : i32, i32
  }
  func.func @transform_7(%arg0: i32) -> (i32, i32) {
    %c0_i32 = arith.constant 0 : i32
    %c0_i32_0 = arith.constant 0 : i32
    return %arg0, %c0_i32 : i32, i32
  }
}

</mosaic_0001>

<bundles_post_ra>
// kernel: tpu_custom_call.1
= control target key start
LH: loop header
LB: loop body
LE: loop exit
PB: predicated region body
PF: predicated region fallthrough
CT: control target
= control target key end

     0   :  { %12 = vsyncpa [#allocation3], 0  ;;  %s2712_s0 = inlined_call_operand.hbm [shape: bf16[8,32], index: 0, kind: input, shape index: {}]   ;;  %s2713_s1 = inlined_call_operand.hbm [shape: bf16[32,512], index: 1, kind: input, shape index: {}]   ;;  %s2714_s2 = inlined_call_operand.hbm [shape: f32[1,512], index: 2, kind: input, shape index: {}]   ;;  %s2715_s3 = inlined_call_operand.hbm [shape: bf16[512,512], index: 3, kind: input, shape index: {}]   ;;  %s2716_s4 = inlined_call_operand.hbm [shape: f32[1,512], index: 4, kind: input, shape index: {}]   ;;  %s2717_s5 = inlined_call_operand.hbm [shape: bf16[512,128], index: 5, kind: input, shape index: {}]   ;;  %s2718_s6 = inlined_call_operand.vmem [shape: f32[1,128], index: 6, kind: input, shape index: {}]   ;;  %s2719_s7 = inlined_call_operand.hbm [shape: f32[8,128], index: 7, kind: output, shape index: {}]  }
   0x1   :  { %13 = vsyncpa [#allocation6], 0 }
   0x2   :  { %14 = vsyncpa [#allocation9], 0 }
   0x3   :  { %15 = vsyncpa [#allocation12], 0  ;;  %s32_s26 = sshll.u32 %s2713_s1, 4  ;;  %s33_s26 = int_to_ptr.hbm [resolvable:$true] %s32_s26 }
   0x4   :  { %16 = vsyncpa [#allocation4], 0  ;;  %s2603_s27 = smov [#allocation5]   ;;  %s56_s8 = sshll.u32 %s2715_s3, 4  ;;  %s57_s8 = int_to_ptr.hbm [resolvable:$true] %s56_s8 }
   0x5   :  { %s34_s28 = sshll.u32 %s2603_s27, 4  ;;  %s2604_s9 = smov 256   ;;  %s35_s28 = int_to_ptr.vmem [resolvable:$true] %s34_s28 }
   0x6   :  { %s2605_s10 = smov 16   ;;  %s2606_s11 = smov [#allocation8]  }
   0x7   :  { %40 = dma.hbm_to_vmem [thread:$0]  %s33_s26, 1024, %s35_s28, [#allocation6], %s2604_s9, %s2604_s9, %s2605_s10  }
   0x8   :  { %s58_s12 = sshll.u32 %s2606_s11, 4  ;;  %s22_s15 = sshll.u32 %s2712_s0, 4  ;;  %s59_s12 = int_to_ptr.vmem [resolvable:$true] %s58_s12  ;;  %s23_s15 = int_to_ptr.hbm [resolvable:$true] %s22_s15 }
   0x9   :  { %64 = dma.hbm_to_vmem [thread:$0]  %s57_s8, 16384, %s59_s12, [#allocation9], %s2604_s9, %s2604_s9, %s2605_s10  }
   0xa   :  { %s46_s17 = sshll.u32 %s2714_s2, 4  ;;  %s2607_s18 = smov [#allocation2]   ;;  %s47_s17 = int_to_ptr.hbm [resolvable:$true] %s46_s17 }
   0xb   :  { %s24_s19 = sshll.u32 %s2607_s18, 4  ;;  %s2608_s3 = smov [#allocation7]   ;;  %s25_s19 = int_to_ptr.vmem [resolvable:$true] %s24_s19 }
   0xc   :  { %27 = dma.hbm_to_vmem [thread:$0]  %s23_s15, 64, %s25_s19, [#allocation3]  }
   0xd   :  { %s48_s20 = sshll.u32 %s2608_s3, 4  ;;  %s70_s23 = sshll.u32 %s2716_s4, 4  ;;  %s49_s20 = int_to_ptr.vmem [resolvable:$true] %s48_s20  ;;  %s71_s23 = int_to_ptr.hbm [resolvable:$true] %s70_s23 }
   0xe   :  { %51 = dma.hbm_to_vmem [thread:$0]  %s47_s17, 64, %s49_s20, [#allocation6]  }
   0xf   :  { %s80_s25 = sshll.u32 %s2717_s5, 4  ;;  %s2609_s26 = smov [#allocation10]   ;;  %s81_s25 = int_to_ptr.hbm [resolvable:$true] %s80_s25 }
  0x10   :  { %s72_s2 = sshll.u32 %s2609_s26, 4  ;;  %s2610_s27 = smov [#allocation11]   ;;  %s73_s2 = int_to_ptr.vmem [resolvable:$true] %s72_s2 }
  0x11   :  { %75 = dma.hbm_to_vmem [thread:$0]  %s71_s23, 64, %s73_s2, [#allocation9]  }
  0x12   :  { %s82_s28 = sshll.u32 %s2610_s27, 4  ;;  %s2611_s29 = smov 64   ;;  %s83_s28 = int_to_ptr.vmem [resolvable:$true] %s82_s28 }
  0x13   :  { %s2612_s30 = smov 4  }
  0x14   :  { %88 = dma.hbm_to_vmem [thread:$0]  %s81_s25, 4096, %s83_s28, [#allocation12], %s2611_s29, %s2611_s29, %s2612_s30  }
  0x15   :  { %2593 = dma.done.wait [#allocation3], 64  }
  0x16   :  { %2594 = vsyncadd [#allocation3], 4294967232 }
  0x17   :  { %2595 = dma.done.wait [#allocation6], 1088  }
  0x18   :  { %2596 = vsyncadd [#allocation6], 4294966208 }
  0x19   :  { %2597 = dma.done.wait [#allocation9], 16448  }
  0x1a   :  { %2598 = vsyncadd [#allocation9], 4294950848 }
  0x1b   :  { %2599 = dma.done.wait [#allocation12], 4096  }
  0x1c   :  { %2600 = vsyncadd [#allocation12], 4294963200  ;;  %vm175_vm0 = vcmask 261120   ;;  %v1585_v0 = vld [vmem:[#allocation5 + $0x20] sm:$0xf]  ;;  %s2613_s8 = smov [#allocation13]  }
  0x1d   :  { %v2249_v1 = vld [vmem:[#allocation5 + $0x2c] sm:$0xf0]  ;;  %v2247_v2 = vld [vmem:[#allocation5 + $0x24] sm:$0xf]  ;;  %v1587_v4 = vld [vmem:[#allocation5 + $0x30] sm:$0xf0] }
  0x1e   :  { %v1586_v3 = vor.u32 %v2249_v1, %v1585_v0  ;;  %v1593_v5 = vld [vmem:[#allocation5 + $0x28] sm:$0xf]  ;;  %v2250_v6 = vld [vmem:[#allocation5 + $0x34] sm:$0xf0]  ;;  %v1590_v7 = vor.u32 %v2247_v2, %v1587_v4  ;;  %v2248_v9 = vld [vmem:[#allocation5 + $0x2c] sm:$0xf] }
  0x1f   :  { %v1594_v8 = vor.u32 %v2250_v6, %v1593_v5  ;;  %v1595_v10 = vld [vmem:[#allocation5 + $0x38] sm:$0xf0]  ;;  %v1569_v11 = vld [vmem:[#allocation5] sm:$0xf]  ;;  %v2245_v13 = vld [vmem:[#allocation5 + $0xc] sm:$0xf0] }
  0x20   :  { %185 = vmatpush.bf16.msra.mxu0 %v1586_v3  ;;  %v1598_v12 = vor.u32 %v2248_v9, %v1595_v10  ;;  %v2243_v14 = vld [vmem:[#allocation5 + $0x4] sm:$0xf]  ;;  %v1571_v15 = vld [vmem:[#allocation5 + $0x10] sm:$0xf0]  ;;  %198 = vmatpush.bf16.msra.mxu1 %v1590_v7  ;;  %v1570_v16 = vor.u32 %v2245_v13, %v1569_v11  ;;  %v1577_v18 = vld [vmem:[#allocation5 + $0x8] sm:$0xf] }
  0x21   :  { %211 = vmatpush.bf16.msra.mxu2 %v1594_v8  ;;  %v1574_v17 = vor.u32 %v2243_v14, %v1571_v15  ;;  %v2246_v19 = vld [vmem:[#allocation5 + $0x14] sm:$0xf0]  ;;  %v2244_v20 = vld [vmem:[#allocation5 + $0xc] sm:$0xf]  ;;  %v1579_v22 = vld [vmem:[#allocation5 + $0x18] sm:$0xf0] }
  0x22   :  { %224 = vmatpush.bf16.msra.mxu3 %v1598_v12  ;;  %v1578_v21 = vor.u32 %v2246_v19, %v1577_v18  ;;  %v116_v23 = vld [vmem:[#allocation2] sm:$0xf]  ;;  %v1717_v24 = vld [vmem:[#allocation8 + $0xe0] sm:$0xf]  ;;  %v1582_v25 = vor.u32 %v2244_v20, %v1579_v22  ;;  %v2281_v26 = vld [vmem:[#allocation8 + $0xec] sm:$0xf0] }
  0x23   :  { %v1845_v27 = vld [vmem:[#allocation8 + $0x1e0] sm:$0xf]  ;;  %v2313_v28 = vld [vmem:[#allocation8 + $0x1ec] sm:$0xf0]  ;;  %v1718_v29 = vor.u32 %v2281_v26, %v1717_v24  ;;  %s1552_s9 = sshll.u32 %s2613_s8, 4  ;;  %s1554_s12 = sshll.u32 %s2719_s7, 4  ;;  %s1553_s9 = int_to_ptr.vmem [resolvable:$true] %s1552_s9  ;;  %s1555_s12 = int_to_ptr.hbm [resolvable:$true] %s1554_s12 }
  0x24   :  { %186 = vmatpush.bf16.msra.mxu0 %v1570_v16  ;;  %v1846_v30 = vor.u32 %v2313_v28, %v1845_v27  ;;  %v1701_v31 = vld [vmem:[#allocation8 + $0xc0] sm:$0xf]  ;;  %v2277_v32 = vld [vmem:[#allocation8 + $0xcc] sm:$0xf0]  ;;  %199 = vmatpush.bf16.msra.mxu1 %v1574_v17 }
  0x25   :  { %v1829_v33 = vld [vmem:[#allocation8 + $0x1c0] sm:$0xf]  ;;  %212 = vmatpush.bf16.msra.mxu2 %v1578_v21  ;;  %v2309_v34 = vld [vmem:[#allocation8 + $0x1cc] sm:$0xf0]  ;;  %v1702_v37 = vor.u32 %v2277_v32, %v1701_v31 }
  0x26   :  { %v1973_v35 = vld [vmem:[#allocation8 + $0x2e0] sm:$0xf]  ;;  %v2345_v36 = vld [vmem:[#allocation8 + $0x2ec] sm:$0xf0]  ;;  %225 = vmatpush.bf16.msra.mxu3 %v1582_v25  ;;  %v1830_v42 = vor.u32 %v2309_v34, %v1829_v33 }
  0x27   :  { %v1974_v38 = vor.u32 %v2345_v36, %v1973_v35  ;;  %v2101_v39 = vld [vmem:[#allocation8 + $0x3e0] sm:$0xf]  ;;  %v2377_v40 = vld [vmem:[#allocation8 + $0x3ec] sm:$0xf0]  ;;  %1599 = vmatmul.msk.bf16.vlgmr.msra.gmra.mxu0 %vm175_vm0, %v116_v23  ;;  %1600 = vmatmul.msk.bf16.vlgmr.msra.gmra.mxu1 %vm175_vm0, %v116_v23 }
  0x28   :  { %1017 = vmatpush.bf16.msrb.mxu0 %v1718_v29  ;;  %v1685_v41 = vld [vmem:[#allocation8 + $0xa0] sm:$0xf]  ;;  %1030 = vmatpush.bf16.msrb.mxu1 %v1846_v30  ;;  %v2102_v43 = vor.u32 %v2377_v40, %v2101_v39  ;;  %v2273_v44 = vld [vmem:[#allocation8 + $0xac] sm:$0xf0] }
  0x29   :  { %v1813_v45 = vld [vmem:[#allocation8 + $0x1a0] sm:$0xf]  ;;  %v2305_v46 = vld [vmem:[#allocation8 + $0x1ac] sm:$0xf0]  ;;  %1601 = vmatmul.msk.bf16.vlgmr.msra.gmra.mxu2 %vm175_vm0, %v116_v23  ;;  %1602 = vmatmul.msk.bf16.vlgmr.msra.gmra.mxu3 %vm175_vm0, %v116_v23  ;;  %v1686_v52 = vor.u32 %v2273_v44, %v1685_v41 }
  0x2a   :  { %v1957_v47 = vld [vmem:[#allocation8 + $0x2c0] sm:$0xf]  ;;  %v2341_v48 = vld [vmem:[#allocation8 + $0x2cc] sm:$0xf0]  ;;  %1043 = vmatpush.bf16.msrb.mxu2 %v1974_v38  ;;  %1056 = vmatpush.bf16.msrb.mxu3 %v2102_v43  ;;  %v1814_v57 = vor.u32 %v2305_v46, %v1813_v45 }
  0x2b   :  { %v2085_v49 = vld [vmem:[#allocation8 + $0x3c0] sm:$0xf]  ;;  %v1958_v50 = vor.u32 %v2341_v48, %v1957_v47  ;;  %v2373_v51 = vld [vmem:[#allocation8 + $0x3cc] sm:$0xf0]  ;;  %v2279_v47 = vld [vmem:[#allocation8 + $0xe4] sm:$0xf] }
  0x2c   :  { %1018 = vmatpush.bf16.msrb.mxu0 %v1702_v37  ;;  %v2086_v53 = vor.u32 %v2373_v51, %v2085_v49  ;;  %v1669_v54 = vld [vmem:[#allocation8 + $0x80] sm:$0xf]  ;;  %v2269_v55 = vld [vmem:[#allocation8 + $0x8c] sm:$0xf0]  ;;  %1031 = vmatpush.bf16.msrb.mxu1 %v1830_v42  ;;  %v1719_v48 = vld [vmem:[#allocation8 + $0xf0] sm:$0xf0] }
  0x2d   :  { %v1941_v56 = vld [vmem:[#allocation8 + $0x2a0] sm:$0xf]  ;;  %v2337_v58 = vld [vmem:[#allocation8 + $0x2ac] sm:$0xf0]  ;;  %v1670_v0 = vor.u32 %v2269_v55, %v1669_v54  ;;  %v2311_v49 = vld [vmem:[#allocation8 + $0x1e4] sm:$0xf] }
  0x2e   :  { %v2069_v59 = vld [vmem:[#allocation8 + $0x3a0] sm:$0xf]  ;;  %v2369_v60 = vld [vmem:[#allocation8 + $0x3ac] sm:$0xf0]  ;;  %1044 = vmatpush.bf16.msrb.mxu2 %v1958_v50  ;;  %v1942_v63 = vor.u32 %v2337_v58, %v1941_v56  ;;  %1057 = vmatpush.bf16.msrb.mxu3 %v2086_v53  ;;  %v1847_v50 = vld [vmem:[#allocation8 + $0x1f0] sm:$0xf0] }
  0x2f   :  { %v1797_v61 = vld [vmem:[#allocation8 + $0x180] sm:$0xf]  ;;  %v2301_v62 = vld [vmem:[#allocation8 + $0x18c] sm:$0xf0]  ;;  %v2070_v1 = vor.u32 %v2369_v60, %v2069_v59  ;;  %v2275_v54 = vld [vmem:[#allocation8 + $0xc4] sm:$0xf]  ;;  %v1722_v59 = vor.u32 %v2279_v47, %v1719_v48 }
  0x30   :  { %1019 = vmatpush.bf16.msrb.mxu0 %v1686_v52  ;;  %v1653_v2 = vld [vmem:[#allocation8 + $0x60] sm:$0xf]  ;;  %v2333_v4 = vld [vmem:[#allocation8 + $0x28c] sm:$0xf0]  ;;  %1032 = vmatpush.bf16.msrb.mxu1 %v1814_v57  ;;  %v1798_v5 = vor.u32 %v2301_v62, %v1797_v61  ;;  %v2343_v61 = vld [vmem:[#allocation8 + $0x2e4] sm:$0xf] }
  0x31   :  { %v1925_v3 = vld [vmem:[#allocation8 + $0x280] sm:$0xf]  ;;  %v2265_v6 = vld [vmem:[#allocation8 + $0x6c] sm:$0xf0]  ;;  %v1975_v62 = vld [vmem:[#allocation8 + $0x2f0] sm:$0xf0] }
  0x32   :  { %v2053_v7 = vld [vmem:[#allocation8 + $0x380] sm:$0xf]  ;;  %v2365_v8 = vld [vmem:[#allocation8 + $0x38c] sm:$0xf0]  ;;  %1045 = vmatpush.bf16.msrb.mxu2 %v1942_v63  ;;  %v1926_v11 = vor.u32 %v2333_v4, %v1925_v3  ;;  %1058 = vmatpush.bf16.msrb.mxu3 %v2070_v1  ;;  %v1654_v12 = vor.u32 %v2265_v6, %v1653_v2  ;;  %v1850_v63 = vor.u32 %v2311_v49, %v1847_v50  ;;  %v2375_v1 = vld [vmem:[#allocation8 + $0x3e4] sm:$0xf] }
  0x33   :  { %v1781_v9 = vld [vmem:[#allocation8 + $0x160] sm:$0xf]  ;;  %v2297_v10 = vld [vmem:[#allocation8 + $0x16c] sm:$0xf0]  ;;  %v2054_v13 = vor.u32 %v2365_v8, %v2053_v7  ;;  %v2103_v2 = vld [vmem:[#allocation8 + $0x3f0] sm:$0xf0]  ;;  %v1978_v7 = vor.u32 %v2343_v61, %v1975_v62 }
  0x34   :  { %1020 = vmatpush.bf16.msrb.mxu0 %v1670_v0  ;;  %v1637_v14 = vld [vmem:[#allocation8 + $0x40] sm:$0xf]  ;;  %v2329_v16 = vld [vmem:[#allocation8 + $0x26c] sm:$0xf0]  ;;  %1033 = vmatpush.bf16.msrb.mxu1 %v1798_v5  ;;  %v1782_v17 = vor.u32 %v2297_v10, %v1781_v9  ;;  %v1703_v0 = vld [vmem:[#allocation8 + $0xd0] sm:$0xf0]  ;;  %v2106_v9 = vor.u32 %v2375_v1, %v2103_v2 }
  0x35   :  { %v1909_v15 = vld [vmem:[#allocation8 + $0x260] sm:$0xf]  ;;  %v2261_v18 = vld [vmem:[#allocation8 + $0x4c] sm:$0xf0]  ;;  %v2307_v3 = vld [vmem:[#allocation8 + $0x1c4] sm:$0xf]  ;;  %v1706_v8 = vor.u32 %v2275_v54, %v1703_v0 }
  0x36   :  { %v2037_v19 = vld [vmem:[#allocation8 + $0x360] sm:$0xf]  ;;  %v2361_v20 = vld [vmem:[#allocation8 + $0x36c] sm:$0xf0]  ;;  %1046 = vmatpush.bf16.msrb.mxu2 %v1926_v11  ;;  %v1910_v23 = vor.u32 %v2329_v16, %v1909_v15  ;;  %1059 = vmatpush.bf16.msrb.mxu3 %v2054_v13  ;;  %v1638_v24 = vor.u32 %v2261_v18, %v1637_v14  ;;  %v1831_v4 = vld [vmem:[#allocation8 + $0x1d0] sm:$0xf0] }
  0x37   :  { %v1765_v21 = vld [vmem:[#allocation8 + $0x140] sm:$0xf]  ;;  %v2293_v22 = vld [vmem:[#allocation8 + $0x14c] sm:$0xf0]  ;;  %v2038_v25 = vor.u32 %v2361_v20, %v2037_v19  ;;  %v2271_v10 = vld [vmem:[#allocation8 + $0xa4] sm:$0xf]  ;;  %v1834_v13 = vor.u32 %v2307_v3, %v1831_v4 }
  0x38   :  { %1021 = vmatpush.bf16.msrb.mxu0 %v1654_v12  ;;  %v1621_v26 = vld [vmem:[#allocation8 + $0x20] sm:$0xf]  ;;  %v2325_v28 = vld [vmem:[#allocation8 + $0x24c] sm:$0xf0]  ;;  %1034 = vmatpush.bf16.msrb.mxu1 %v1782_v17  ;;  %v1766_v29 = vor.u32 %v2293_v22, %v1765_v21  ;;  %v2339_v11 = vld [vmem:[#allocation8 + $0x2c4] sm:$0xf] }
  0x39   :  { %v1893_v27 = vld [vmem:[#allocation8 + $0x240] sm:$0xf]  ;;  %v2257_v30 = vld [vmem:[#allocation8 + $0x2c] sm:$0xf0]  ;;  %v1959_v12 = vld [vmem:[#allocation8 + $0x2d0] sm:$0xf0] }
  0x3a   :  { %v2021_v31 = vld [vmem:[#allocation8 + $0x340] sm:$0xf]  ;;  %v2357_v32 = vld [vmem:[#allocation8 + $0x34c] sm:$0xf0]  ;;  %1047 = vmatpush.bf16.msrb.mxu2 %v1910_v23  ;;  %v1894_v35 = vor.u32 %v2325_v28, %v1893_v27  ;;  %1060 = vmatpush.bf16.msrb.mxu3 %v2038_v25  ;;  %v1622_v37 = vor.u32 %v2257_v30, %v1621_v26  ;;  %v1687_v14 = vld [vmem:[#allocation8 + $0xb0] sm:$0xf0]  ;;  %v1962_v19 = vor.u32 %v2339_v11, %v1959_v12 }
  0x3b   :  { %v1749_v33 = vld [vmem:[#allocation8 + $0x120] sm:$0xf]  ;;  %v2289_v34 = vld [vmem:[#allocation8 + $0x12c] sm:$0xf0]  ;;  %v2022_v38 = vor.u32 %v2357_v32, %v2021_v31  ;;  %v2371_v15 = vld [vmem:[#allocation8 + $0x3c4] sm:$0xf]  ;;  %v1690_v20 = vor.u32 %v2271_v10, %v1687_v14 }
  0x3c   :  { %v1605_v36 = vld [vmem:[#allocation8] sm:$0xf]  ;;  %1022 = vmatpush.bf16.msrb.mxu0 %v1638_v24  ;;  %v2253_v39 = vld [vmem:[#allocation8 + $0xc] sm:$0xf0]  ;;  %1035 = vmatpush.bf16.msrb.mxu1 %v1766_v29  ;;  %v1750_v42 = vor.u32 %v2289_v34, %v1749_v33  ;;  %v2087_v16 = vld [vmem:[#allocation8 + $0x3d0] sm:$0xf0] }
  0x3d   :  { %v1877_v40 = vld [vmem:[#allocation8 + $0x220] sm:$0xf]  ;;  %v2321_v41 = vld [vmem:[#allocation8 + $0x22c] sm:$0xf0]  ;;  %v1606_v52 = vor.u32 %v2253_v39, %v1605_v36  ;;  %v2303_v17 = vld [vmem:[#allocation8 + $0x1a4] sm:$0xf]  ;;  %v2090_v21 = vor.u32 %v2371_v15, %v2087_v16 }
  0x3e   :  { %v1733_v43 = vld [vmem:[#allocation8 + $0x100] sm:$0xf]  ;;  %v2353_v45 = vld [vmem:[#allocation8 + $0x32c] sm:$0xf0]  ;;  %1048 = vmatpush.bf16.msrb.mxu2 %v1894_v35  ;;  %v1878_v51 = vor.u32 %v2321_v41, %v1877_v40  ;;  %1061 = vmatpush.bf16.msrb.mxu3 %v2022_v38  ;;  %v1815_v18 = vld [vmem:[#allocation8 + $0x1b0] sm:$0xf0] }
  0x3f   :  { %v2005_v44 = vld [vmem:[#allocation8 + $0x320] sm:$0xf]  ;;  %v2285_v46 = vld [vmem:[#allocation8 + $0x10c] sm:$0xf0]  ;;  %v2267_v22 = vld [vmem:[#allocation8 + $0x84] sm:$0xf]  ;;  %v1818_v25 = vor.u32 %v2303_v17, %v1815_v18 }
  0x40   :  { %1023 = vmatpush.bf16.msrb.mxu0 %v1622_v37  ;;  %v2006_v53 = vor.u32 %v2353_v45, %v2005_v44  ;;  %v1861_v55 = vld [vmem:[#allocation8 + $0x200] sm:$0xf]  ;;  %v2317_v56 = vld [vmem:[#allocation8 + $0x20c] sm:$0xf0]  ;;  %1036 = vmatpush.bf16.msrb.mxu1 %v1750_v42  ;;  %v1734_v58 = vor.u32 %v2285_v46, %v1733_v43  ;;  %v2335_v23 = vld [vmem:[#allocation8 + $0x2a4] sm:$0xf] }
  0x41   :  { %v1989_v57 = vld [vmem:[#allocation8 + $0x300] sm:$0xf]  ;;  %v2349_v60 = vld [vmem:[#allocation8 + $0x30c] sm:$0xf0]  ;;  %v1862_v5 = vor.u32 %v2317_v56, %v1861_v55  ;;  %v1943_v24 = vld [vmem:[#allocation8 + $0x2b0] sm:$0xf0] }
  0x42   :  { %1049 = vmatpush.bf16.msrb.mxu2 %v1878_v51  ;;  %1062 = vmatpush.bf16.msrb.mxu3 %v2006_v53  ;;  %v1990_v6 = vor.u32 %v2349_v60, %v1989_v57  ;;  %v1671_v26 = vld [vmem:[#allocation8 + $0x90] sm:$0xf0]  ;;  %v2367_v27 = vld [vmem:[#allocation8 + $0x3a4] sm:$0xf]  ;;  %v1946_v31 = vor.u32 %v2335_v23, %v1943_v24 }
  0x43   :  { %v2071_v28 = vld [vmem:[#allocation8 + $0x3b0] sm:$0xf0]  ;;  %v2299_v29 = vld [vmem:[#allocation8 + $0x184] sm:$0xf]  ;;  %v1674_v32 = vor.u32 %v2267_v22, %v1671_v26 }
  0x44   :  { %1024 = vmatpush.bf16.msrb.mxu0 %v1606_v52  ;;  %1037 = vmatpush.bf16.msrb.mxu1 %v1734_v58  ;;  %v1799_v30 = vld [vmem:[#allocation8 + $0x190] sm:$0xf0]  ;;  %v2074_v33 = vor.u32 %v2367_v27, %v2071_v28  ;;  %v2263_v34 = vld [vmem:[#allocation8 + $0x64] sm:$0xf] }
  0x45   :  { %v2331_v35 = vld [vmem:[#allocation8 + $0x284] sm:$0xf]  ;;  %v1927_v36 = vld [vmem:[#allocation8 + $0x290] sm:$0xf0]  ;;  %v1802_v37 = vor.u32 %v2299_v29, %v1799_v30 }
  0x46   :  { %1050 = vmatpush.bf16.msrb.mxu2 %v1862_v5  ;;  %1063 = vmatpush.bf16.msrb.mxu3 %v1990_v6  ;;  %v1655_v38 = vld [vmem:[#allocation8 + $0x70] sm:$0xf0]  ;;  %v2363_v39 = vld [vmem:[#allocation8 + $0x384] sm:$0xf]  ;;  %v1930_v43 = vor.u32 %v2331_v35, %v1927_v36  ;;  %v2314_v35 = vld [vmem:[#allocation8 + $0x1f4] sm:$0xf0] }
  0x47   :  { %v2055_v40 = vld [vmem:[#allocation8 + $0x390] sm:$0xf0]  ;;  %v2295_v41 = vld [vmem:[#allocation8 + $0x164] sm:$0xf]  ;;  %v1658_v44 = vor.u32 %v2263_v34, %v1655_v38  ;;  %v1853_v34 = vld [vmem:[#allocation8 + $0x1e8] sm:$0xf] }
  0x48   :  { %1069 = vmatpush.bf16.msra.mxu0 %v1722_v59  ;;  %1082 = vmatpush.bf16.msra.mxu1 %v1850_v63  ;;  %v1783_v42 = vld [vmem:[#allocation8 + $0x170] sm:$0xf0]  ;;  %v2058_v45 = vor.u32 %v2363_v39, %v2055_v40  ;;  %v2259_v47 = vld [vmem:[#allocation8 + $0x44] sm:$0xf] }
  0x49   :  { %v1786_v46 = vor.u32 %v2295_v41, %v1783_v42  ;;  %v1639_v48 = vld [vmem:[#allocation8 + $0x50] sm:$0xf0]  ;;  %v2291_v49 = vld [vmem:[#allocation8 + $0x144] sm:$0xf]  ;;  %v1854_v42 = vor.u32 %v2314_v35, %v1853_v34 }
  0x4a   :  { %1095 = vmatpush.bf16.msra.mxu2 %v1978_v7  ;;  %1108 = vmatpush.bf16.msra.mxu3 %v2106_v9  ;;  %v1767_v50 = vld [vmem:[#allocation8 + $0x150] sm:$0xf0]  ;;  %v1642_v51 = vor.u32 %v2259_v47, %v1639_v48  ;;  %v2327_v53 = vld [vmem:[#allocation8 + $0x264] sm:$0xf]  ;;  %v2310_v47 = vld [vmem:[#allocation8 + $0x1d4] sm:$0xf0] }
  0x4b   :  { %v1770_v52 = vor.u32 %v2291_v49, %v1767_v50  ;;  %v1911_v54 = vld [vmem:[#allocation8 + $0x270] sm:$0xf0]  ;;  %v2359_v55 = vld [vmem:[#allocation8 + $0x364] sm:$0xf] }
  0x4c   :  { %1070 = vmatpush.bf16.msra.mxu0 %v1706_v8  ;;  %1083 = vmatpush.bf16.msra.mxu1 %v1834_v13  ;;  %v1914_v56 = vor.u32 %v2327_v53, %v1911_v54  ;;  %v2039_v57 = vld [vmem:[#allocation8 + $0x370] sm:$0xf0]  ;;  %v2255_v59 = vld [vmem:[#allocation8 + $0x24] sm:$0xf]  ;;  %v1981_v53 = vld [vmem:[#allocation8 + $0x2e8] sm:$0xf] }
  0x4d   :  { %v2042_v58 = vor.u32 %v2359_v55, %v2039_v57  ;;  %v1623_v60 = vld [vmem:[#allocation8 + $0x30] sm:$0xf0]  ;;  %v2287_v62 = vld [vmem:[#allocation8 + $0x124] sm:$0xf]  ;;  %v2346_v54 = vld [vmem:[#allocation8 + $0x2f4] sm:$0xf0] }
  0x4e   :  { %1096 = vmatpush.bf16.msra.mxu2 %v1962_v19  ;;  %1109 = vmatpush.bf16.msra.mxu3 %v2090_v21  ;;  %v1626_v61 = vor.u32 %v2255_v59, %v1623_v60  ;;  %v1751_v63 = vld [vmem:[#allocation8 + $0x130] sm:$0xf0]  ;;  %v2323_v1 = vld [vmem:[#allocation8 + $0x244] sm:$0xf]  ;;  %v2109_v55 = vld [vmem:[#allocation8 + $0x3e8] sm:$0xf] }
  0x4f   :  { %v1754_v0 = vor.u32 %v2287_v62, %v1751_v63  ;;  %v1895_v2 = vld [vmem:[#allocation8 + $0x250] sm:$0xf0]  ;;  %v2355_v3 = vld [vmem:[#allocation8 + $0x344] sm:$0xf]  ;;  %v2378_v59 = vld [vmem:[#allocation8 + $0x3f4] sm:$0xf0] }
  0x50   :  { %1071 = vmatpush.bf16.msra.mxu0 %v1690_v20  ;;  %1084 = vmatpush.bf16.msra.mxu1 %v1818_v25  ;;  %v1898_v4 = vor.u32 %v2323_v1, %v1895_v2  ;;  %v2023_v5 = vld [vmem:[#allocation8 + $0x350] sm:$0xf0]  ;;  %v2251_v7 = vld [vmem:[#allocation8 + $0x4] sm:$0xf]  ;;  %v125_v25 = vld [vmem:[#allocation7] sm:$0xf]  ;;  %v1982_v2 = vor.u32 %v2346_v54, %v1981_v53 }
  0x51   :  { %v2026_v6 = vor.u32 %v2355_v3, %v2023_v5  ;;  %v1607_v8 = vld [vmem:[#allocation8 + $0x10] sm:$0xf0]  ;;  %v2283_v9 = vld [vmem:[#allocation8 + $0x104] sm:$0xf]  ;;  %v127_v26 = vperm.slane %v125_v25, 0  ;;  %v128_v27 = vperm.slane %v125_v25, 1 }
  0x52   :  { %1097 = vmatpush.bf16.msra.mxu2 %v1946_v31  ;;  %1110 = vmatpush.bf16.msra.mxu3 %v2074_v33  ;;  %v1610_v10 = vor.u32 %v2251_v7, %v1607_v8  ;;  %v1735_v11 = vld [vmem:[#allocation8 + $0x110] sm:$0xf0]  ;;  %v2319_v13 = vld [vmem:[#allocation8 + $0x224] sm:$0xf]  ;;  %v1725_v31 = vld [vmem:[#allocation8 + $0xe8] sm:$0xf] }
  0x53   :  { %v1738_v12 = vor.u32 %v2283_v9, %v1735_v11  ;;  %v1879_v14 = vld [vmem:[#allocation8 + $0x230] sm:$0xf0]  ;;  %v2351_v16 = vld [vmem:[#allocation8 + $0x324] sm:$0xf]  ;;  %v129_v38 = vperm.slane %v125_v25, 2  ;;  %v130_v41 = vperm.slane %v125_v25, 3 }
  0x54   :  { %1072 = vmatpush.bf16.msra.mxu0 %v1674_v32  ;;  %1085 = vmatpush.bf16.msra.mxu1 %v1802_v37  ;;  %v1882_v15 = vor.u32 %v2319_v13, %v1879_v14  ;;  %v2007_v17 = vld [vmem:[#allocation8 + $0x330] sm:$0xf0]  ;;  %v2315_v19 = vld [vmem:[#allocation8 + $0x204] sm:$0xf]  ;;  %v2282_v32 = vld [vmem:[#allocation8 + $0xf4] sm:$0xf0] }
  0x55   :  { %v2010_v18 = vor.u32 %v2351_v16, %v2007_v17  ;;  %v1863_v20 = vld [vmem:[#allocation8 + $0x210] sm:$0xf0]  ;;  %v2347_v22 = vld [vmem:[#allocation8 + $0x304] sm:$0xf]  ;;  %v1726_v39 = vor.u32 %v2282_v32, %v1725_v31  ;;  %v1693_v60 = vld [vmem:[#allocation8 + $0xa8] sm:$0xf] }
  0x56   :  { %1098 = vmatpush.bf16.msra.mxu2 %v1930_v43  ;;  %1111 = vmatpush.bf16.msra.mxu3 %v2058_v45  ;;  %v1866_v21 = vor.u32 %v2315_v19, %v1863_v20  ;;  %v1991_v23 = vld [vmem:[#allocation8 + $0x310] sm:$0xf0]  ;;  %v1709_v43 = vld [vmem:[#allocation8 + $0xc8] sm:$0xf]  ;;  %v2342_v7 = vld [vmem:[#allocation8 + $0x2d4] sm:$0xf0] }
  0x57   :  { %v1994_v24 = vor.u32 %v2347_v22, %v1991_v23  ;;  %v1821_v63 = vld [vmem:[#allocation8 + $0x1a8] sm:$0xf]  ;;  %v2374_v11 = vld [vmem:[#allocation8 + $0x3d4] sm:$0xf0] }
  0x58   :  { %1073 = vmatpush.bf16.msra.mxu0 %v1658_v44  ;;  %1086 = vmatpush.bf16.msra.mxu1 %v1786_v46  ;;  %v2278_v44 = vld [vmem:[#allocation8 + $0xd4] sm:$0xf0]  ;;  %v1837_v46 = vld [vmem:[#allocation8 + $0x1c8] sm:$0xf] }
  0x59   :  { %v2093_v8 = vld [vmem:[#allocation8 + $0x3c8] sm:$0xf]  ;;  %v2270_v13 = vld [vmem:[#allocation8 + $0x94] sm:$0xf0] }
  0x5a   :  { %1099 = vmatpush.bf16.msra.mxu2 %v1914_v56  ;;  %1112 = vmatpush.bf16.msra.mxu3 %v2042_v58  ;;  %v1838_v58 = vor.u32 %v2310_v47, %v1837_v46  ;;  %v1805_v14 = vld [vmem:[#allocation8 + $0x188] sm:$0xf]  ;;  %v2094_v19 = vor.u32 %v2374_v11, %v2093_v8  ;;  %v2338_v22 = vld [vmem:[#allocation8 + $0x2b4] sm:$0xf0]  ;;  %v2312_v8 = vld [vmem:[#allocation8 + $0x1ec] sm:$0xf] }
  0x5b   :  { %v2370_v25 = vld [vmem:[#allocation8 + $0x3b4] sm:$0xf0]  ;;  %v1933_v32 = vld [vmem:[#allocation8 + $0x288] sm:$0xf] }
  0x5c   :  { %1074 = vmatpush.bf16.msra.mxu0 %v1642_v51  ;;  %1087 = vmatpush.bf16.msra.mxu1 %v1770_v52  ;;  %v1710_v52 = vor.u32 %v2278_v44, %v1709_v43  ;;  %v1917_v46 = vld [vmem:[#allocation8 + $0x268] sm:$0xf]  ;;  %v2330_v47 = vld [vmem:[#allocation8 + $0x274] sm:$0xf0] }
  0x5d   :  { %v2258_v53 = vld [vmem:[#allocation8 + $0x34] sm:$0xf0]  ;;  %v1757_v54 = vld [vmem:[#allocation8 + $0x128] sm:$0xf] }
  0x5e   :  { %1100 = vmatpush.bf16.msra.mxu2 %v1898_v4  ;;  %1113 = vmatpush.bf16.msra.mxu3 %v2026_v6  ;;  %v2110_v4 = vor.u32 %v2378_v59, %v2109_v55  ;;  %v1965_v6 = vld [vmem:[#allocation8 + $0x2c8] sm:$0xf]  ;;  %v2290_v55 = vld [vmem:[#allocation8 + $0x134] sm:$0xf0] }
  0x5f   :  { %v1966_v17 = vor.u32 %v2342_v7, %v1965_v6  ;;  %v2326_v59 = vld [vmem:[#allocation8 + $0x254] sm:$0xf0]  ;;  %v1727_v7 = vld [vmem:[#allocation8 + $0xf8] sm:$0xf0] }
  0x60   :  { %1075 = vmatpush.bf16.msra.mxu0 %v1626_v61  ;;  %1088 = vmatpush.bf16.msra.mxu1 %v1754_v0  ;;  %v2274_v61 = vld [vmem:[#allocation8 + $0xb4] sm:$0xf0] }
  0x61   :  { %v2306_v0 = vld [vmem:[#allocation8 + $0x1b4] sm:$0xf0]  ;;  %v1694_v5 = vor.u32 %v2274_v61, %v1693_v60  ;;  %v2029_v60 = vld [vmem:[#allocation8 + $0x348] sm:$0xf] }
  0x62   :  { %1101 = vmatpush.bf16.msra.mxu2 %v1882_v15  ;;  %1114 = vmatpush.bf16.msra.mxu3 %v2010_v18  ;;  %v2302_v15 = vld [vmem:[#allocation8 + $0x194] sm:$0xf0] }
  0x63   :  { %v1806_v23 = vor.u32 %v2302_v15, %v1805_v14 }
  0x64   :  { %1076 = vmatpush.bf16.msra.mxu0 %v1610_v10  ;;  %1089 = vmatpush.bf16.msra.mxu1 %v1738_v12  ;;  %v1822_v10 = vor.u32 %v2306_v0, %v1821_v63  ;;  %v1677_v12 = vld [vmem:[#allocation8 + $0x88] sm:$0xf]  ;;  %v2358_v63 = vld [vmem:[#allocation8 + $0x354] sm:$0xf0] }
  0x65   :  { %v1678_v20 = vor.u32 %v2270_v13, %v1677_v12  ;;  %v1613_v0 = vld [vmem:[#allocation8 + $0x8] sm:$0xf]  ;;  %v2030_v11 = vor.u32 %v2358_v63, %v2029_v60  ;;  %v2322_v13 = vld [vmem:[#allocation8 + $0x234] sm:$0xf0]  ;;  %v2079_v63 = vld [vmem:[#allocation8 + $0x3b8] sm:$0xf0] }
  0x66   :  { %1102 = vmatpush.bf16.msra.mxu2 %v1866_v21  ;;  %1115 = vmatpush.bf16.msra.mxu3 %v1994_v24  ;;  %v1949_v21 = vld [vmem:[#allocation8 + $0x2a8] sm:$0xf] }
  0x67   :  { %v2077_v24 = vld [vmem:[#allocation8 + $0x3a8] sm:$0xf] }
  0x68   :  { %v2078_v31 = vor.u32 %v2370_v25, %v2077_v24  ;;  %v1885_v12 = vld [vmem:[#allocation8 + $0x228] sm:$0xf]  ;;  %v1839_v24 = vld [vmem:[#allocation8 + $0x1d8] sm:$0xf0] }
  0xa4   :  { %v188_v28 = vpop.f32.mrf.mxu0  ;;  %v201_v30 = vpop.f32.mrf.mxu1 }
  0xa5   :  { %v189_v29 = vadd.f32 %v188_v28, %v127_v26  ;;  %v202_v33 = vadd.f32 %v201_v30, %v128_v27  ;;  %v1661_v26 = vld [vmem:[#allocation8 + $0x68] sm:$0xf]  ;;  %v2266_v27 = vld [vmem:[#allocation8 + $0x74] sm:$0xf0]  ;;  %v1950_v30 = vor.u32 %v2338_v22, %v1949_v21  ;;  %v1886_v21 = vor.u32 %v2322_v13, %v1885_v12  ;;  %v1711_v22 = vld [vmem:[#allocation8 + $0xd8] sm:$0xf0] }
  0xa6   :  { %v1789_v28 = vld [vmem:[#allocation8 + $0x168] sm:$0xf]  ;;  %v1662_v34 = vor.u32 %v2266_v27, %v1661_v26  ;;  %v2318_v27 = vld [vmem:[#allocation8 + $0x214] sm:$0xf0]  ;;  %v2364_v12 = vld [vmem:[#allocation8 + $0x38c] sm:$0xf] }
  0xa7   :  { %v231_v36 = vmax.f32 %v189_v29, 0.0  ;;  %v232_v37 = vmax.f32 %v202_v33, 0.0  ;;  %v2298_v29 = vld [vmem:[#allocation8 + $0x174] sm:$0xf0]  ;;  %v1869_v26 = vld [vmem:[#allocation8 + $0x208] sm:$0xf] }
  0xa8   :  { %v2334_v33 = vld [vmem:[#allocation8 + $0x294] sm:$0xf0]  ;;  %v1790_v35 = vor.u32 %v2298_v29, %v1789_v28  ;;  %v1997_v28 = vld [vmem:[#allocation8 + $0x308] sm:$0xf]  ;;  %v2063_v13 = vld [vmem:[#allocation8 + $0x398] sm:$0xf0] }
  0xa9   :  { %v2676_v40 = vpack.c.bf16 %v231_v36, %v231_v36  ;;  %v2678_v45 = vpack.c.bf16 %v232_v37, %v232_v37  ;;  %v2061_v36 = vld [vmem:[#allocation8 + $0x388] sm:$0xf]  ;;  %v2366_v37 = vld [vmem:[#allocation8 + $0x394] sm:$0xf0]  ;;  %v1934_v43 = vor.u32 %v2334_v33, %v1933_v32 }
  0xaa   :  { %v2062_v44 = vor.u32 %v2366_v37, %v2061_v36  ;;  %v2350_v29 = vld [vmem:[#allocation8 + $0x314] sm:$0xf0]  ;;  %v2272_v36 = vld [vmem:[#allocation8 + $0xac] sm:$0xf]  ;;  %v1870_v37 = vor.u32 %v2318_v27, %v1869_v26  ;;  %v1631_v27 = vld [vmem:[#allocation8 + $0x38] sm:$0xf0] }
  0xab   :  { %1025 = vmatmul.bf16.vlgmr.msrb.gmra.mxu0 %v2676_v40  ;;  %1038 = vmatmul.bf16.vlgmr.msrb.gmra.mxu1 %v2678_v45  ;;  %v2256_v26 = vld [vmem:[#allocation8 + $0x2c] sm:$0xf] }
  0xac   :  { %v214_v48 = vpop.f32.mrf.mxu2  ;;  %v227_v50 = vpop.f32.mrf.mxu3  ;;  %1121 = vmatpush.bf16.msrb.mxu0 %v1726_v39  ;;  %1134 = vmatpush.bf16.msrb.mxu1 %v1854_v42  ;;  %v2262_v39 = vld [vmem:[#allocation8 + $0x54] sm:$0xf0] }
  0xad   :  { %v215_v49 = vadd.f32 %v214_v48, %v129_v38  ;;  %v190_v51 = vpop.f32.mrf.mxu0  ;;  %v228_v56 = vadd.f32 %v227_v50, %v130_v41  ;;  %v203_v57 = vpop.f32.mrf.mxu1  ;;  %v1645_v38 = vld [vmem:[#allocation8 + $0x48] sm:$0xf]  ;;  %v2294_v42 = vld [vmem:[#allocation8 + $0x154] sm:$0xf0] }
  0xae   :  { %v1773_v41 = vld [vmem:[#allocation8 + $0x148] sm:$0xf]  ;;  %v1646_v48 = vor.u32 %v2262_v39, %v1645_v38  ;;  %v2362_v51 = vld [vmem:[#allocation8 + $0x374] sm:$0xf0]  ;;  %v1695_v38 = vld [vmem:[#allocation8 + $0xb8] sm:$0xf0] }
  0xaf   :  { %v233_v62 = vmax.f32 %v215_v49, 0.0  ;;  %v234_v1 = vmax.f32 %v228_v56, 0.0  ;;  %v1774_v49 = vor.u32 %v2294_v42, %v1773_v41  ;;  %v2045_v50 = vld [vmem:[#allocation8 + $0x368] sm:$0xf]  ;;  %v1918_v56 = vor.u32 %v2330_v47, %v1917_v46  ;;  %v2304_v39 = vld [vmem:[#allocation8 + $0x1ac] sm:$0xf] }
  0xb0   :  { %1122 = vmatpush.bf16.msrb.mxu0 %v1710_v52  ;;  %1135 = vmatpush.bf16.msrb.mxu1 %v1838_v58  ;;  %v1629_v52 = vld [vmem:[#allocation8 + $0x28] sm:$0xf]  ;;  %v2046_v57 = vor.u32 %v2362_v51, %v2045_v50  ;;  %v1823_v41 = vld [vmem:[#allocation8 + $0x1b8] sm:$0xf0]  ;;  %v1998_v42 = vor.u32 %v2350_v29, %v1997_v28  ;;  %v2340_v46 = vld [vmem:[#allocation8 + $0x2cc] sm:$0xf] }
  0xb1   :  { %v2682_v3 = vpack.c.bf16 %v233_v62, %v233_v62  ;;  %v2684_v9 = vpack.c.bf16 %v234_v1, %v234_v1  ;;  %v1901_v58 = vld [vmem:[#allocation8 + $0x248] sm:$0xf]  ;;  %v1630_v61 = vor.u32 %v2258_v53, %v1629_v52  ;;  %v1758_v62 = vor.u32 %v2290_v55, %v1757_v54  ;;  %v2254_v1 = vld [vmem:[#allocation8 + $0x14] sm:$0xf0]  ;;  %v1967_v47 = vld [vmem:[#allocation8 + $0x2d8] sm:$0xf0] }
  0xb2   :  { %v1902_v6 = vor.u32 %v2326_v59, %v1901_v58  ;;  %v1614_v14 = vor.u32 %v2254_v1, %v1613_v0  ;;  %v2372_v50 = vld [vmem:[#allocation8 + $0x3cc] sm:$0xf]  ;;  %v2095_v51 = vld [vmem:[#allocation8 + $0x3d8] sm:$0xf0] }
  0xb3   :  { %1051 = vmatmul.bf16.vlgmr.msrb.gmra.mxu2 %v2682_v3  ;;  %1064 = vmatmul.bf16.vlgmr.msrb.gmra.mxu3 %v2684_v9  ;;  %v2268_v52 = vld [vmem:[#allocation8 + $0x8c] sm:$0xf]  ;;  %v1679_v53 = vld [vmem:[#allocation8 + $0x98] sm:$0xf0] }
  0xb4   :  { %1147 = vmatpush.bf16.msrb.mxu2 %v1982_v2  ;;  %v216_v16 = vpop.f32.mrf.mxu2  ;;  %1160 = vmatpush.bf16.msrb.mxu3 %v2110_v4  ;;  %v229_v18 = vpop.f32.mrf.mxu3  ;;  %v1741_v2 = vld [vmem:[#allocation8 + $0x108] sm:$0xf]  ;;  %v2286_v4 = vld [vmem:[#allocation8 + $0x114] sm:$0xf0]  ;;  %v2300_v54 = vld [vmem:[#allocation8 + $0x18c] sm:$0xf]  ;;  %v1682_v60 = vor.u32 %v2268_v52, %v1679_v53 }
  0xb5   :  { %1123 = vmatpush.bf16.msrb.mxu0 %v1694_v5  ;;  %1136 = vmatpush.bf16.msrb.mxu1 %v1822_v10  ;;  %v2280_v5 = vld [vmem:[#allocation8 + $0xec] sm:$0xf]  ;;  %v1855_v10 = vld [vmem:[#allocation8 + $0x1f8] sm:$0xf0]  ;;  %v1742_v15 = vor.u32 %v2286_v4, %v1741_v2  ;;  %v2013_v16 = vld [vmem:[#allocation8 + $0x328] sm:$0xf] }
  0xb6   :  { %v1730_v18 = vor.u32 %v2280_v5, %v1727_v7  ;;  %v1807_v55 = vld [vmem:[#allocation8 + $0x198] sm:$0xf0]  ;;  %v2336_v58 = vld [vmem:[#allocation8 + $0x2ac] sm:$0xf] }
  0xb7   :  { %v1951_v59 = vld [vmem:[#allocation8 + $0x2b8] sm:$0xf0]  ;;  %v2264_v0 = vld [vmem:[#allocation8 + $0x6c] sm:$0xf] }
  0xb8   :  { %1148 = vmatpush.bf16.msrb.mxu2 %v1966_v17  ;;  %1161 = vmatpush.bf16.msrb.mxu3 %v2094_v19  ;;  %v2354_v17 = vld [vmem:[#allocation8 + $0x334] sm:$0xf0]  ;;  %v1858_v19 = vor.u32 %v2312_v8, %v1855_v10  ;;  %v1663_v1 = vld [vmem:[#allocation8 + $0x78] sm:$0xf0]  ;;  %v2296_v2 = vld [vmem:[#allocation8 + $0x16c] sm:$0xf]  ;;  %v1954_v5 = vor.u32 %v2336_v58, %v1951_v59 }
  0xb9   :  { %1124 = vmatpush.bf16.msrb.mxu0 %v1678_v20  ;;  %1137 = vmatpush.bf16.msrb.mxu1 %v1806_v23  ;;  %v2276_v20 = vld [vmem:[#allocation8 + $0xcc] sm:$0xf]  ;;  %v2014_v25 = vor.u32 %v2354_v17, %v2013_v16  ;;  %v1791_v4 = vld [vmem:[#allocation8 + $0x178] sm:$0xf0]  ;;  %v1666_v10 = vor.u32 %v2264_v0, %v1663_v1  ;;  %v2385_v59 = vld [vmem:[#allocation11 + $0x30] sm:$0xff] }
  0xba   :  { %v2308_v23 = vld [vmem:[#allocation8 + $0x1cc] sm:$0xf]  ;;  %v1714_v32 = vor.u32 %v2276_v20, %v1711_v22  ;;  %v1935_v8 = vld [vmem:[#allocation8 + $0x298] sm:$0xf0] }
  0xbb   :  { %1077 = vmatmul.bf16.vlgmr.msra.gmra.mxu0 %v2676_v40  ;;  %1090 = vmatmul.bf16.vlgmr.msra.gmra.mxu1 %v2678_v45  ;;  %v1842_v33 = vor.u32 %v2308_v23, %v1839_v24  ;;  %v2332_v7 = vld [vmem:[#allocation8 + $0x28c] sm:$0xf]  ;;  %v1775_v17 = vld [vmem:[#allocation8 + $0x158] sm:$0xf0] }
  0xbc   :  { %1149 = vmatpush.bf16.msrb.mxu2 %v1950_v30  ;;  %1162 = vmatpush.bf16.msrb.mxu3 %v2078_v31  ;;  %v2344_v30 = vld [vmem:[#allocation8 + $0x2ec] sm:$0xf]  ;;  %v1983_v31 = vld [vmem:[#allocation8 + $0x2f8] sm:$0xf0] }
  0xbd   :  { %1125 = vmatpush.bf16.msrb.mxu0 %v1662_v34  ;;  %1138 = vmatpush.bf16.msrb.mxu1 %v1790_v35  ;;  %v2376_v34 = vld [vmem:[#allocation8 + $0x3ec] sm:$0xf]  ;;  %v2111_v35 = vld [vmem:[#allocation8 + $0x3f8] sm:$0xf0] }
  0xbe   :  { %v2292_v16 = vld [vmem:[#allocation8 + $0x14c] sm:$0xf]  ;;  %v1759_v29 = vld [vmem:[#allocation8 + $0x138] sm:$0xf0] }
  0xbf   :  { %v2328_v20 = vld [vmem:[#allocation8 + $0x26c] sm:$0xf]  ;;  %v1778_v23 = vor.u32 %v2292_v16, %v1775_v17  ;;  %v2386_v52 = vld [vmem:[#allocation11 + $0x38] sm:$0xff]  ;;  %v2387_v16 = vld [vmem:[#allocation11 + $0x40] sm:$0xff] }
  0xc0   :  { %1150 = vmatpush.bf16.msrb.mxu2 %v1934_v43  ;;  %1163 = vmatpush.bf16.msrb.mxu3 %v2062_v44  ;;  %v1986_v43 = vor.u32 %v2344_v30, %v1983_v31  ;;  %v2114_v44 = vor.u32 %v2376_v34, %v2111_v35  ;;  %v2360_v24 = vld [vmem:[#allocation8 + $0x36c] sm:$0xf]  ;;  %v1634_v34 = vor.u32 %v2256_v26, %v1631_v27  ;;  %v1999_v58 = vld [vmem:[#allocation8 + $0x318] sm:$0xf0]  ;;  %v2399_v17 = vld [vmem:[#allocation11 + $0xa0] sm:$0xff] }
  0xc1   :  { %1126 = vmatpush.bf16.msrb.mxu0 %v1646_v48  ;;  %1139 = vmatpush.bf16.msrb.mxu1 %v1774_v49  ;;  %v1698_v48 = vor.u32 %v2272_v36, %v1695_v38  ;;  %v1826_v49 = vor.u32 %v2304_v39, %v1823_v41  ;;  %v2288_v28 = vld [vmem:[#allocation8 + $0x12c] sm:$0xf]  ;;  %v1615_v39 = vld [vmem:[#allocation8 + $0x18] sm:$0xf0] }
  0xc2   :  { %v1762_v35 = vor.u32 %v2288_v28, %v1759_v29  ;;  %v2356_v36 = vld [vmem:[#allocation8 + $0x34c] sm:$0xf]  ;;  %v2394_v0 = vld [vmem:[#allocation11 + $0x78] sm:$0xff] }
  0xc3   :  { %1103 = vmatmul.bf16.vlgmr.msra.gmra.mxu2 %v2682_v3  ;;  %1116 = vmatmul.bf16.vlgmr.msra.gmra.mxu3 %v2684_v9  ;;  %v2252_v38 = vld [vmem:[#allocation8 + $0xc] sm:$0xf]  ;;  %v2382_v1 = vld [vmem:[#allocation11 + $0x18] sm:$0xff] }
  0xc4   :  { %1151 = vmatpush.bf16.msrb.mxu2 %v1918_v56  ;;  %1164 = vmatpush.bf16.msrb.mxu3 %v2046_v57  ;;  %v1970_v56 = vor.u32 %v2340_v46, %v1967_v47  ;;  %v2098_v57 = vor.u32 %v2372_v50, %v2095_v51  ;;  %v2284_v41 = vld [vmem:[#allocation8 + $0x10c] sm:$0xf]  ;;  %v1887_v47 = vld [vmem:[#allocation8 + $0x238] sm:$0xf0] }
  0xc5   :  { %1127 = vmatpush.bf16.msrb.mxu0 %v1630_v61  ;;  %1140 = vmatpush.bf16.msrb.mxu1 %v1758_v62  ;;  %v1810_v61 = vor.u32 %v2300_v54, %v1807_v55  ;;  %v2368_v62 = vld [vmem:[#allocation8 + $0x3ac] sm:$0xf]  ;;  %v2015_v51 = vld [vmem:[#allocation8 + $0x338] sm:$0xf0] }
  0xc6   :  { %v2320_v46 = vld [vmem:[#allocation8 + $0x22c] sm:$0xf] }
  0xc7   :  { %v2352_v50 = vld [vmem:[#allocation8 + $0x32c] sm:$0xf]  ;;  %v1890_v53 = vor.u32 %v2320_v46, %v1887_v47 }
  0xc8   :  { %1152 = vmatpush.bf16.msrb.mxu2 %v1902_v6  ;;  %1165 = vmatpush.bf16.msrb.mxu3 %v2030_v11  ;;  %v2082_v6 = vor.u32 %v2368_v62, %v2079_v63  ;;  %v1794_v11 = vor.u32 %v2296_v2, %v1791_v4  ;;  %v2018_v54 = vor.u32 %v2352_v50, %v2015_v51  ;;  %v2316_v55 = vld [vmem:[#allocation8 + $0x20c] sm:$0xf]  ;;  %v2383_v63 = vld [vmem:[#allocation11 + $0x20] sm:$0xff]  ;;  %v2381_v2 = vld [vmem:[#allocation11 + $0x10] sm:$0xff] }
  0xc9   :  { %1128 = vmatpush.bf16.msrb.mxu0 %v1614_v14  ;;  %1141 = vmatpush.bf16.msrb.mxu1 %v1742_v15  ;;  %v2260_v14 = vld [vmem:[#allocation8 + $0x4c] sm:$0xf]  ;;  %v1647_v15 = vld [vmem:[#allocation8 + $0x58] sm:$0xf0] }
  0xca   :  { %v1650_v22 = vor.u32 %v2260_v14, %v1647_v15  ;;  %v2384_v62 = vld [vmem:[#allocation11 + $0x28] sm:$0xff] }
  0xcb   :  { %v2392_v4 = vld [vmem:[#allocation11 + $0x68] sm:$0xff] }
  0xcc   :  { %1153 = vmatpush.bf16.msrb.mxu2 %v1886_v21  ;;  %1166 = vmatpush.bf16.msrb.mxu3 %v2014_v25  ;;  %v1919_v21 = vld [vmem:[#allocation8 + $0x278] sm:$0xf0]  ;;  %v2396_v27 = vld [vmem:[#allocation11 + $0x88] sm:$0xff] }
  0xcd   :  { %1173 = vmatpush.bf16.msra.mxu0 %v1730_v18  ;;  %1186 = vmatpush.bf16.msra.mxu1 %v1858_v19  ;;  %v1938_v18 = vor.u32 %v2332_v7, %v1935_v8  ;;  %v2066_v19 = vor.u32 %v2364_v12, %v2063_v13  ;;  %v2047_v25 = vld [vmem:[#allocation8 + $0x378] sm:$0xf0]  ;;  %v1922_v30 = vor.u32 %v2328_v20, %v1919_v21  ;;  %v2389_v7 = vld [vmem:[#allocation11 + $0x50] sm:$0xff]  ;;  %v2400_v12 = vld [vmem:[#allocation11 + $0xa8] sm:$0xff] }
  0xce   :  { %1129 = vmatmul.bf16.vlgmr.msrb.gmra.mxu0 %v2676_v40  ;;  %1142 = vmatmul.bf16.vlgmr.msrb.gmra.mxu1 %v2678_v45  ;;  %v2050_v31 = vor.u32 %v2360_v24, %v2047_v25  ;;  %v2401_v8 = vld [vmem:[#allocation11 + $0xb0] sm:$0xff] }
  0xd0   :  { %1154 = vmatpush.bf16.msrb.mxu2 %v1870_v37  ;;  %1167 = vmatpush.bf16.msrb.mxu3 %v1998_v42  ;;  %v2031_v37 = vld [vmem:[#allocation8 + $0x358] sm:$0xf0] }
  0xd1   :  { %1174 = vmatpush.bf16.msra.mxu0 %v1714_v32  ;;  %1187 = vmatpush.bf16.msra.mxu1 %v1842_v33  ;;  %v2324_v32 = vld [vmem:[#allocation8 + $0x24c] sm:$0xf]  ;;  %v1903_v33 = vld [vmem:[#allocation8 + $0x258] sm:$0xf0] }
  0xd2   :  { %v1743_v42 = vld [vmem:[#allocation8 + $0x118] sm:$0xf0] }
  0xd3   :  { %1155 = vmatmul.bf16.vlgmr.msrb.gmra.mxu2 %v2682_v3  ;;  %1168 = vmatmul.bf16.vlgmr.msrb.gmra.mxu3 %v2684_v9 }
  0xd4   :  { %1199 = vmatpush.bf16.msra.mxu2 %v1986_v43  ;;  %1212 = vmatpush.bf16.msra.mxu3 %v2114_v44  ;;  %v1906_v43 = vor.u32 %v2324_v32, %v1903_v33  ;;  %v2034_v44 = vor.u32 %v2356_v36, %v2031_v37  ;;  %v2395_v32 = vld [vmem:[#allocation11 + $0x80] sm:$0xff]  ;;  %v2410_v33 = vld [vmem:[#allocation11 + $0xf8] sm:$0xff] }
  0xd5   :  { %1175 = vmatpush.bf16.msra.mxu0 %v1698_v48  ;;  %1188 = vmatpush.bf16.msra.mxu1 %v1826_v49  ;;  %v1618_v48 = vor.u32 %v2252_v38, %v1615_v39  ;;  %v1746_v49 = vor.u32 %v2284_v41, %v1743_v42  ;;  %v2409_v38 = vld [vmem:[#allocation11 + $0xf0] sm:$0xff] }
  0xd8   :  { %1200 = vmatpush.bf16.msra.mxu2 %v1970_v56  ;;  %1213 = vmatpush.bf16.msra.mxu3 %v2098_v57  ;;  %v1871_v56 = vld [vmem:[#allocation8 + $0x218] sm:$0xf0]  ;;  %v2348_v57 = vld [vmem:[#allocation8 + $0x30c] sm:$0xf] }
  0xd9   :  { %1176 = vmatpush.bf16.msra.mxu0 %v1682_v60  ;;  %1189 = vmatpush.bf16.msra.mxu1 %v1810_v61  ;;  %v1874_v60 = vor.u32 %v2316_v55, %v1871_v56  ;;  %v2002_v61 = vor.u32 %v2348_v57, %v1999_v58 }
  0xdc   :  { %1201 = vmatpush.bf16.msra.mxu2 %v1954_v5  ;;  %1214 = vmatpush.bf16.msra.mxu3 %v2082_v6  ;;  %v2379_v5 = vld [vmem:[#allocation11] sm:$0xff] }
  0xdd   :  { %1177 = vmatpush.bf16.msra.mxu0 %v1666_v10  ;;  %1190 = vmatpush.bf16.msra.mxu1 %v1794_v11  ;;  %v2391_v6 = vld [vmem:[#allocation11 + $0x60] sm:$0xff]  ;;  %v2700_v10 = vld [vmem:[#allocation10] sm:$0xf]  ;;  %v2388_v11 = vld [vmem:[#allocation11 + $0x48] sm:$0xff] }
  0xde   :  { %v369_v15 = vperm.slane %v2700_v10, 0  ;;  %v371_v56 = vperm.slane %v2700_v10, 2 }
  0xe0   :  { %1202 = vmatpush.bf16.msra.mxu2 %v1938_v18  ;;  %1215 = vmatpush.bf16.msra.mxu3 %v2066_v19  ;;  %v2398_v19 = vld [vmem:[#allocation11 + $0x98] sm:$0xff] }
  0xe1   :  { %1178 = vmatpush.bf16.msra.mxu0 %v1650_v22  ;;  %1191 = vmatpush.bf16.msra.mxu1 %v1778_v23  ;;  %v2397_v23 = vld [vmem:[#allocation11 + $0x90] sm:$0xff] }
  0xe4   :  { %1203 = vmatpush.bf16.msra.mxu2 %v1922_v30  ;;  %1216 = vmatpush.bf16.msra.mxu3 %v2050_v31 }
  0xe5   :  { %1179 = vmatpush.bf16.msra.mxu0 %v1634_v34  ;;  %1192 = vmatpush.bf16.msra.mxu1 %v1762_v35  ;;  %v370_v35 = vperm.slane %v2700_v10, 1 }
  0xe8   :  { %1204 = vmatpush.bf16.msra.mxu2 %v1906_v43  ;;  %1217 = vmatpush.bf16.msra.mxu3 %v2034_v44  ;;  %v2408_v43 = vld [vmem:[#allocation11 + $0xe8] sm:$0xff] }
  0xe9   :  { %1180 = vmatpush.bf16.msra.mxu0 %v1618_v48  ;;  %1193 = vmatpush.bf16.msra.mxu1 %v1746_v49  ;;  %v2407_v49 = vld [vmem:[#allocation11 + $0xe0] sm:$0xff] }
  0xec   :  { %1205 = vmatpush.bf16.msra.mxu2 %v1890_v53  ;;  %1218 = vmatpush.bf16.msra.mxu3 %v2018_v54 }
  0xed   :  { %1493 = vmatpush.bf16.msrb.mxu0 %v2386_v52  ;;  %1194 = vmatmul.bf16.vlgmr.msra.gmra.mxu1 %v2678_v45  ;;  %v2380_v45 = vld [vmem:[#allocation11 + $0x8] sm:$0xff]  ;;  %v2406_v52 = vld [vmem:[#allocation11 + $0xd8] sm:$0xff] }
  0xee   :  { %1181 = vmatmul.bf16.vlgmr.msra.gmra.mxu0 %v2676_v40  ;;  %1506 = vmatpush.bf16.msrb.mxu1 %v2394_v0  ;;  %v2393_v40 = vld [vmem:[#allocation11 + $0x70] sm:$0xff] }
  0xf0   :  { %1206 = vmatpush.bf16.msra.mxu2 %v1874_v60  ;;  %1219 = vmatpush.bf16.msra.mxu3 %v2002_v61 }
  0xf1   :  { %1494 = vmatpush.bf16.msrb.mxu0 %v2385_v59  ;;  %v2405_v59 = vld [vmem:[#allocation11 + $0xd0] sm:$0xff] }
  0xf2   :  { %1507 = vmatpush.bf16.msrb.mxu1 %v2393_v40 }
  0xf3   :  { %1207 = vmatmul.bf16.vlgmr.msra.gmra.mxu2 %v2682_v3  ;;  %1220 = vmatmul.bf16.vlgmr.msra.gmra.mxu3 %v2684_v9  ;;  %v2390_v3 = vld [vmem:[#allocation11 + $0x58] sm:$0xff] }
  0xf4   :  { %v2402_v9 = vld [vmem:[#allocation11 + $0xb8] sm:$0xff]  ;;  %1532 = vmatpush.bf16.msrb.mxu3 %v2410_v33 }
  0xf5   :  { %1495 = vmatpush.bf16.msrb.mxu0 %v2384_v62  ;;  %1519 = vmatpush.bf16.msrb.mxu2 %v2402_v9 }
  0xf6   :  { %1508 = vmatpush.bf16.msrb.mxu1 %v2392_v4 }
  0xf8   :  { %1533 = vmatpush.bf16.msrb.mxu3 %v2409_v38 }
  0xf9   :  { %1496 = vmatpush.bf16.msrb.mxu0 %v2383_v63  ;;  %1520 = vmatpush.bf16.msrb.mxu2 %v2401_v8  ;;  %v2404_v63 = vld [vmem:[#allocation11 + $0xc8] sm:$0xff] }
  0xfa   :  { %1509 = vmatpush.bf16.msrb.mxu1 %v2391_v6 }
  0xfc   :  { %1534 = vmatpush.bf16.msrb.mxu3 %v2408_v43 }
  0xfd   :  { %1497 = vmatpush.bf16.msrb.mxu0 %v2382_v1  ;;  %1521 = vmatpush.bf16.msrb.mxu2 %v2400_v12 }
  0xfe   :  { %1510 = vmatpush.bf16.msrb.mxu1 %v2390_v3 }
 0x100   :  { %1535 = vmatpush.bf16.msrb.mxu3 %v2407_v49 }
 0x101   :  { %1498 = vmatpush.bf16.msrb.mxu0 %v2381_v2  ;;  %1522 = vmatpush.bf16.msrb.mxu2 %v2399_v17 }
 0x102   :  { %1511 = vmatpush.bf16.msrb.mxu1 %v2389_v7 }
 0x104   :  { %1536 = vmatpush.bf16.msrb.mxu3 %v2406_v52 }
 0x105   :  { %1499 = vmatpush.bf16.msrb.mxu0 %v2380_v45  ;;  %1523 = vmatpush.bf16.msrb.mxu2 %v2398_v19  ;;  %v2403_v45 = vld [vmem:[#allocation11 + $0xc0] sm:$0xff] }
 0x106   :  { %1512 = vmatpush.bf16.msrb.mxu1 %v2388_v11  ;;  %v372_v11 = vperm.slane %v2700_v10, 3  ;;  %v2422_v10 = vld [vmem:[%s2718_s6] ss:$0 sm:$0xff] }
 0x108   :  { %1537 = vmatpush.bf16.msrb.mxu3 %v2405_v59 }
 0x109   :  { %1500 = vmatpush.bf16.msrb.mxu0 %v2379_v5  ;;  %1524 = vmatpush.bf16.msrb.mxu2 %v2397_v23 }
 0x10a   :  { %1513 = vmatpush.bf16.msrb.mxu1 %v2387_v16 }
 0x10c   :  { %1538 = vmatpush.bf16.msrb.mxu3 %v2404_v63 }
 0x10d   :  { %1525 = vmatpush.bf16.msrb.mxu2 %v2396_v27 }
 0x110   :  { %1539 = vmatpush.bf16.msrb.mxu3 %v2403_v45 }
 0x111   :  { %1526 = vmatpush.bf16.msrb.mxu2 %v2395_v32 }
 0x128   :  { %v1026_v13 = vpop.f32.mrf.mxu0  ;;  %v1039_v14 = vpop.f32.mrf.mxu1 }
 0x129   :  { %v1027_v18 = vadd.f32 %v1026_v13, %v369_v15 }
 0x12b   :  { %v1040_v22 = vadd.f32 %v1039_v14, %v1027_v18 }
 0x130   :  { %v1028_v20 = vpop.f32.mrf.mxu0  ;;  %v1041_v21 = vpop.f32.mrf.mxu1 }
 0x136   :  { %v1052_v24 = vpop.f32.mrf.mxu2  ;;  %v1065_v26 = vpop.f32.mrf.mxu3 }
 0x137   :  { %v1053_v25 = vadd.f32 %v1052_v24, %v1040_v22 }
 0x138   :  { %v1078_v29 = vpop.f32.mrf.mxu0  ;;  %v1091_v30 = vpop.f32.mrf.mxu1 }
 0x139   :  { %v1066_v28 = vadd.f32 %v1065_v26, %v1053_v25  ;;  %v1079_v39 = vadd.f32 %v1078_v29, %v370_v35 }
 0x13b   :  { %v1225_v31 = vmax.f32 %v1066_v28, 0.0  ;;  %v1092_v44 = vadd.f32 %v1091_v30, %v1079_v39 }
 0x13d   :  { %v1229_v34 = vpack.c.bf16 %v1225_v31, %v1225_v31 }
 0x13e   :  { %v1054_v36 = vpop.f32.mrf.mxu2  ;;  %v1067_v37 = vpop.f32.mrf.mxu3 }
 0x13f   :  { %1501 = vmatmul.bf16.vlgmr.msrb.gmra.mxu0 %v1229_v34 }
 0x140   :  { %v1080_v41 = vpop.f32.mrf.mxu0  ;;  %v1093_v42 = vpop.f32.mrf.mxu1 }
 0x146   :  { %v1104_v46 = vpop.f32.mrf.mxu2  ;;  %v1117_v48 = vpop.f32.mrf.mxu3 }
 0x147   :  { %v1105_v47 = vadd.f32 %v1104_v46, %v1092_v44 }
 0x149   :  { %v1118_v50 = vadd.f32 %v1117_v48, %v1105_v47 }
 0x14b   :  { %v1130_v51 = vpop.f32.mrf.mxu0  ;;  %v1226_v53 = vmax.f32 %v1118_v50, 0.0  ;;  %v1143_v54 = vpop.f32.mrf.mxu1 }
 0x14c   :  { %v1131_v60 = vadd.f32 %v1130_v51, %v371_v56 }
 0x14d   :  { %v1230_v55 = vpack.c.bf16 %v1226_v53, %v1226_v53 }
 0x14e   :  { %v1106_v57 = vpop.f32.mrf.mxu2  ;;  %v1119_v58 = vpop.f32.mrf.mxu3  ;;  %v1144_v0 = vadd.f32 %v1143_v54, %v1131_v60 }
 0x14f   :  { %1514 = vmatmul.bf16.vlgmr.msrb.gmra.mxu1 %v1230_v55 }
 0x153   :  { %v1132_v61 = vpop.f32.mrf.mxu0  ;;  %v1145_v62 = vpop.f32.mrf.mxu1 }
 0x156   :  { %v1156_v1 = vpop.f32.mrf.mxu2  ;;  %v1169_v2 = vpop.f32.mrf.mxu3 }
 0x157   :  { %v1157_v40 = vadd.f32 %v1156_v1, %v1144_v0 }
 0x159   :  { %v1170_v4 = vadd.f32 %v1169_v2, %v1157_v40 }
 0x15b   :  { %v1227_v5 = vmax.f32 %v1170_v4, 0.0 }
 0x15d   :  { %v1231_v6 = vpack.c.bf16 %v1227_v5, %v1227_v5 }
 0x15e   :  { %v1158_v3 = vpop.f32.mrf.mxu2  ;;  %v1171_v9 = vpop.f32.mrf.mxu3 }
 0x15f   :  { %1527 = vmatmul.bf16.vlgmr.msrb.gmra.mxu2 %v1231_v6 }
 0x16a   :  { %v1195_v8 = vpop.f32.mrf.mxu1 }
 0x16b   :  { %v1182_v7 = vpop.f32.mrf.mxu0 }
 0x16c   :  { %v1183_v12 = vadd.f32 %v1182_v7, %v372_v11 }
 0x16e   :  { %v1196_v15 = vadd.f32 %v1195_v8, %v1183_v12 }
 0x172   :  { %v1197_v14 = vpop.f32.mrf.mxu1 }
 0x173   :  { %v1184_v13 = vpop.f32.mrf.mxu0 }
 0x176   :  { %v1208_v16 = vpop.f32.mrf.mxu2  ;;  %v1221_v18 = vpop.f32.mrf.mxu3 }
 0x177   :  { %v1209_v17 = vadd.f32 %v1208_v16, %v1196_v15 }
 0x179   :  { %v1222_v19 = vadd.f32 %v1221_v18, %v1209_v17 }
 0x17b   :  { %v1228_v20 = vmax.f32 %v1222_v19, 0.0 }
 0x17d   :  { %v1232_v21 = vpack.c.bf16 %v1228_v20, %v1228_v20 }
 0x17e   :  { %v1210_v22 = vpop.f32.mrf.mxu2  ;;  %v1223_v23 = vpop.f32.mrf.mxu3 }
 0x17f   :  { %1540 = vmatmul.bf16.vlgmr.msrb.gmra.mxu3 %v1232_v21 }
 0x1bc   :  { %v1502_v24 = vpop.f32.mrf.mxu0 }
 0x1bd   :  { %v1503_v30 = vadd.f32 %v2422_v10, %v1502_v24 }
 0x1c4   :  { %v1504_v25 = vpop.f32.mrf.mxu0 }
 0x1cc   :  { %v1515_v26 = vpop.f32.mrf.mxu1 }
 0x1cd   :  { %v1516_v31 = vadd.f32 %v1515_v26, %v1503_v30 }
 0x1d4   :  { %v1517_v27 = vpop.f32.mrf.mxu1 }
 0x1e2   :  { %v1528_v28 = vpop.f32.mrf.mxu2 }
 0x1e3   :  { %v1529_v32 = vadd.f32 %v1528_v28, %v1516_v31 }
 0x1ea   :  { %v1530_v29 = vpop.f32.mrf.mxu2 }
 0x202   :  { %v1541_v33 = vpop.f32.mrf.mxu3 }
 0x203   :  { %v1542_v34 = vadd.f32 %v1541_v33, %v1529_v32 }
 0x205   :  { %2423 = vtanh.f32 %v1542_v34 }
 0x20a   :  { %v1543_v35 = vpop.f32.mrf.mxu3 }
 0x20b   :  { %v2424_v36 = vpop.eup %2423 }
 0x20c   :  { %1546 = vst [vmem:[#allocation13] sm:$0xff] %v2424_v36 }
 0x20d   :  { %1557 = dma.vmem_to_hbm [thread:$0]  %s1553_s9, 128, %s1555_s12, [#allocation4]  }
 0x20e   :  { %2601 = dma.done.wait [#allocation4], 128  }
 0x20f   :  { %2602 = vsyncadd [#allocation4], 4294967168 }
 0x210   :  { %1562 = vsyncpa [#allocation3], 1 }
 0x211   :  { %1563 = vsyncpa [#allocation6], 1 }
 0x212   :  { %1564 = vsyncpa [#allocation9], 1 }
 0x213   :  { %1565 = vsyncpa [#allocation12], 1 }
 0x214   :  { %1566 = vsyncpa [#allocation4], 1 }

</bundles_post_ra>
